<compile_context>
chip_gen: v7x
topology: tpu7x:2x2x1
jax: 0.10.0
libtpu: 0.0.40
codegen_flags: <defaults>
</compile_context>

<pallas_src>
import functools

import jax
import jax.numpy as jnp
from jax.experimental import pallas as pl
from jax.experimental.pallas import tpu as pltpu

N_HIDDEN = 128               # "n" of the module
K_PHI = 4                    # "k" of the module (only feeds dead code)
IN_FEATURES = 32 * 32 * 3    # 3072
OUT_FEATURES = 100
OUT_PADDED = 128             # lane-dense output width (100 -> 128, zero-padded)


def _round_up(x, m):
    return (x + m - 1) // m * m


def kan_kernel(x_ref, wc_ref, bc_ref, o_ref):
    """Single fused affine map for one batch tile.

    x_ref:  (TB, 3072) f32    batch tile of the flattened input
    wc_ref: (3072, 128) bf16  folded weight  W1^T @ W2^T_pad
    bc_ref: (1, 128)   f32    folded bias    b1 @ W2^T_pad + b2_pad
    o_ref:  (TB, 128)  f32    lane-dense output (cols >= 100 come from zero cols)
    """
    x_bf = x_ref[...].astype(jnp.bfloat16)
    z = jnp.dot(x_bf, wc_ref[...], preferred_element_type=jnp.float32)
    o_ref[...] = z + bc_ref[...]


@functools.partial(jax.jit, static_argnames=("block_b",))
def kan_forward(x_nchw, wc_bf16, bc, *, block_b=512):
    """x_nchw: (B, 3, 32, 32) f32.  wc_bf16: (3072, 128) bf16 folded weight,
       bc: (128,) f32 folded bias.  Returns (B, 100) f32."""
    B = x_nchw.shape[0]
    x = x_nchw.reshape(B, IN_FEATURES)           # == torch .view(-1, 3072)

    # Batch tile: block == full dim for tiny B (always legal), otherwise a
    # multiple of 8 capped at block_b and sized so the grid has >= 2 steps
    # (lets the "parallel" axis shard across v7x's 2 TensorCores).
    if B <= 8:
        TB = B
    else:
        TB = min(block_b, _round_up(pl.cdiv(B, 2), 8))
    nb = pl.cdiv(B, TB)                          # ragged last block is masked

    bc_2d = bc.reshape(1, OUT_PADDED)

    flops = 2 * B * IN_FEATURES * OUT_PADDED
    bytes_accessed = (B * IN_FEATURES * 4            # x (f32)
                      + IN_FEATURES * OUT_PADDED * 2  # Wc (bf16)
                      + OUT_PADDED * 4                # bc (f32)
                      + B * OUT_PADDED * 4)           # out (f32)

    out = pl.pallas_call(
        kan_kernel,
        out_shape=jax.ShapeDtypeStruct((B, OUT_PADDED), jnp.float32),
        grid_spec=pltpu.PrefetchScalarGridSpec(
            num_scalar_prefetch=0,
            grid=(nb,),
            in_specs=[
                pl.BlockSpec((TB, IN_FEATURES), lambda i: (i, 0)),      # x tile
                pl.BlockSpec((IN_FEATURES, OUT_PADDED), lambda i: (0, 0),
                             pipeline_mode=pl.Buffered(1)),             # Wc
                pl.BlockSpec((1, OUT_PADDED), lambda i: (0, 0),
                             pipeline_mode=pl.Buffered(1)),             # bc
            ],
            out_specs=pl.BlockSpec((TB, OUT_PADDED), lambda i: (i, 0)),
        ),
        compiler_params=pltpu.CompilerParams(
            dimension_semantics=("parallel",),       # batch axis: shard across TCs
            vmem_limit_bytes=48 * 1024 * 1024,       # room for TB=512 f32 x tiles
        ),
        cost_estimate=pl.CostEstimate(
            flops=flops, transcendentals=0, bytes_accessed=bytes_accessed),
    )(x, wc_bf16, bc_2d)

    return out[:, :OUT_FEATURES]


def prepare_params(w1, b1, w2, b2):
    """Fold fc1 + linear (no activation between them in the reference) into one
    affine map, in kernel-friendly lane-dense layout.  Done once, outside jit."""
    w1t = jnp.asarray(w1, jnp.float32).T                               # (3072, 128)
    w2t_pad = jnp.zeros((N_HIDDEN, OUT_PADDED), jnp.float32)
    w2t_pad = w2t_pad.at[:, :OUT_FEATURES].set(jnp.asarray(w2, jnp.float32).T)
    b2_pad = jnp.zeros((OUT_PADDED,), jnp.float32)
    b2_pad = b2_pad.at[:OUT_FEATURES].set(jnp.asarray(b2, jnp.float32))
    wc = w1t @ w2t_pad                                                 # (3072, 128)
    bc = jnp.asarray(b1, jnp.float32) @ w2t_pad + b2_pad               # (128,)
    return wc.astype(jnp.bfloat16), bc


def reference_forward(x_nchw, w1, b1, w2, b2):
    x = x_nchw.reshape(x_nchw.shape[0], IN_FEATURES)
    h = x @ w1.T + b1
    return h @ w2.T + b2


if __name__ == "__main__":
    key = jax.random.PRNGKey(0)
    k_x, k_w1, k_b1, k_w2, k_b2, k_w, k_n, k_pj, k_pij = jax.random.split(key, 9)

    B = 2
    x = jax.random.normal(k_x, (B, 3, 32, 32), dtype=jnp.float32)

    # Deterministic parameter init (shapes from the module's __init__).
    w1 = jax.random.normal(k_w1, (N_HIDDEN, IN_FEATURES), jnp.float32) * 0.02
    b1 = jax.random.normal(k_b1, (N_HIDDEN,), jnp.float32) * 0.02
    w2 = jax.random.normal(k_w2, (OUT_FEATURES, N_HIDDEN), jnp.float32) * 0.02
    b2 = jax.random.normal(k_b2, (OUT_FEATURES,), jnp.float32) * 0.02

    # Dead-code parameters of the module (feed only part1/part2, whose result
    # is overwritten by `Z = self.linear(X)` before return).
    w_param = jax.random.normal(k_w, (N_HIDDEN,), jnp.float32)
    n_param = jax.random.normal(k_n, (N_HIDDEN,), jnp.float32)
    phi_j = jax.random.normal(k_pj, (K_PHI,), jnp.float32)
    phi_ij = jax.random.normal(k_pij, (N_HIDDEN, K_PHI), jnp.float32)
    # TODO(synk): part1/part2 (Kolmogorov-Arnold sums) are dead code in the
    # reference forward (Z is overwritten by self.linear(X)), so they are
    # intentionally not computed in the kernel.

    wc_bf16, bc = prepare_params(w1, b1, w2, b2)

    out = kan_forward(x, wc_bf16, bc)
    jax.block_until_ready(out)

    ref = reference_forward(x, w1, b1, w2, b2)
    assert out.shape == (B, OUT_FEATURES)
    # bf16 MXU operands (f32 accumulation) -> ~1e-3-class absolute error on
    # O(0.25)-magnitude outputs; tolerance loosened vs the f32 reference.
    assert jnp.allclose(out, ref, atol=2e-2, rtol=2e-2)

    print("KERNEL_OK")
</pallas_src>

<mosaic_0001>
module attributes {stable_mosaic.version = 11 : i64} {
  func.func @kan_kernel(%arg0: i32, %arg1: memref<2x3072xf32, #tpu.memory_space<vmem>>, %arg2: memref<3072x128xbf16, #tpu.memory_space<vmem>>, %arg3: memref<1x128xf32, #tpu.memory_space<vmem>>, %arg4: memref<2x128xf32, #tpu.memory_space<vmem>>) attributes {dimension_semantics = [#tpu.dimension_semantics<parallel>], iteration_bounds = array<i64: 1>, scalar_prefetch = 0 : i64, scratch_operands = 0 : i64, tpu.core_type = #tpu.core_type<tc>, window_params = [{transform_indices = @transform_0, window_bounds = array<i64: 2, 3072>}, {pipeline_mode = #tpu.pipeline_mode<synchronous>, transform_indices = @transform_1, window_bounds = array<i64: 3072, 128>}, {pipeline_mode = #tpu.pipeline_mode<synchronous>, transform_indices = @transform_2, window_bounds = array<i64: 1, 128>}, {transform_indices = @transform_3, window_bounds = array<i64: 2, 128>}]} {
    %c0 = arith.constant 0 : index
    %c0_0 = arith.constant 0 : index
    %0 = vector.load %arg1[%c0, %c0_0] : memref<2x3072xf32, #tpu.memory_space<vmem>>, vector<2x3072xf32>
    %1 = arith.truncf %0 : vector<2x3072xf32> to vector<2x3072xbf16>
    %c0_1 = arith.constant 0 : index
    %c0_2 = arith.constant 0 : index
    %2 = vector.load %arg2[%c0_1, %c0_2] : memref<3072x128xbf16, #tpu.memory_space<vmem>>, vector<3072x128xbf16>
    %cst = arith.constant dense<0.000000e+00> : vector<2x128xf32>
    %3 = tpu.matmul %1, %2, %cst {dimension_numbers = #tpu.dot_dimension_numbers<[1], [0], [0], [1], [0, 0, 1, 1], [], []>} : vector<2x3072xbf16>, vector<3072x128xbf16>, vector<2x128xf32> -> vector<2x128xf32>
    %c0_3 = arith.constant 0 : index
    %c0_4 = arith.constant 0 : index
    %4 = vector.load %arg3[%c0_3, %c0_4] : memref<1x128xf32, #tpu.memory_space<vmem>>, vector<1x128xf32>
    %5 = vector.broadcast %4 : vector<1x128xf32> to vector<2x128xf32>
    %6 = arith.addf %3, %5 : vector<2x128xf32>
    %c0_5 = arith.constant 0 : index
    %c0_6 = arith.constant 0 : index
    %7 = vector.load %arg4[%c0_5, %c0_6] : memref<2x128xf32, #tpu.memory_space<vmem>>, vector<2x128xf32>
    tpu.vector_store %arg4[%c0_5, %c0_6], %6 {strides = array<i32>} : memref<2x128xf32, #tpu.memory_space<vmem>>, vector<2x128xf32>,
    return
  }
  func.func @transform_0(%arg0: i32) -> (i32, i32) {
    %c0_i32 = arith.constant 0 : i32
    %c0_i32_0 = arith.constant 0 : i32
    return %arg0, %c0_i32 : i32, i32
  }
  func.func @transform_1(%arg0: i32) -> (i32, i32) {
    %c0_i32 = arith.constant 0 : i32
    %c0_i32_0 = arith.constant 0 : i32
    %c0_i32_1 = arith.constant 0 : i32
    return %c0_i32, %c0_i32_0 : i32, i32
  }
  func.func @transform_2(%arg0: i32) -> (i32, i32) {
    %c0_i32 = arith.constant 0 : i32
    %c0_i32_0 = arith.constant 0 : i32
    %c0_i32_1 = arith.constant 0 : i32
    return %c0_i32, %c0_i32_0 : i32, i32
  }
  func.func @transform_3(%arg0: i32) -> (i32, i32) {
    %c0_i32 = arith.constant 0 : i32
    %c0_i32_0 = arith.constant 0 : i32
    return %arg0, %c0_i32 : i32, i32
  }
}

</mosaic_0001>

<bundles_post_ra>
// kernel: kan_forward.1
= control target key start
LH: loop header
LB: loop body
LE: loop exit
PB: predicated region body
PF: predicated region fallthrough
CT: control target
= control target key end

     0   :  { %8 = vsyncpa [#allocation3], 0  ;;  %s3023_s0 = inlined_call_operand.vmem [shape: f32[2,3072], index: 0, kind: input, shape index: {}]   ;;  %s3024_s1 = inlined_call_operand.hbm [shape: bf16[3072,128], index: 1, kind: input, shape index: {}]   ;;  %s3025_s2 = inlined_call_operand.vmem [shape: f32[1,128], index: 2, kind: input, shape index: {}]   ;;  %s3026_s3 = inlined_call_operand.hbm [shape: f32[2,128], index: 3, kind: output, shape index: {}]  }
   0x1   :  { %9 = vsyncpa [#allocation4], 0  ;;  %s2939_s12 = smov [#allocation2]   ;;  %s2891_s16 = scalar_lea.hbm %s3024_s1, 24576 }
   0x2   :  { %s17_s13 = sshll.u32 %s2939_s12, 4  ;;  %p2892_p0 = scmp.ne.s32.totalorder %s3024_s1, %s2891_s16  ;;  %s18_s13 = int_to_ptr.vmem [resolvable:$true] %s17_s13 }
   0x3   :  { %p2895_p1 = scmp.lt.u32.totalorder %s2891_s16, %s3024_s1 }
   0x5   :  { %p2897_p2 = pnand %p2895_p1, %p2892_p0 }
   0x7   :  { %2900 = shalt.err (!%p2897_p2)
}
   0x8   :  { %s2901_s21 = scalar_lea.vmem %s18_s13, 24576  ;;  %p2906_p4 = scmp.lt.s32.totalorder %s18_s13, %s18_s13 }
   0x9   :  { %p2902_p3 = scmp.ne.s32.totalorder %s18_s13, %s2901_s21  ;;  %p2907_p5 = scmp.lt.s32.totalorder %s2901_s21, %s2901_s21 }
   0xb   :  { %p2908_p6 = por %p2907_p5, %p2906_p4 }
   0xd   :  { %p2909_p7 = pnand %p2908_p6, %p2902_p3 }
   0xf   :  { %2912 = shalt.err (!%p2909_p7)
}
  0x10   :  { %s2940_s22 = smov 64   ;;  %s2941_s23 = smov 4  }
  0x11   :  { %23 = dma.hbm_to_vmem [thread:$0]  %s3024_s1, 24576, %s18_s13, [#allocation3], %s2940_s22, %s2940_s22, %s2941_s23  }
  0x12   :  { %2935 = dma.done.wait [#allocation3], 24576  }
  0x13   :  { %2936 = vsyncadd [#allocation3], 4294942720  ;;  %v2693_v0 = vld [vmem:[#allocation2 + $0x40] sm:$0xff]   ;;  %v2697_v4 = vld [vmem:[#allocation2 + $0x48] sm:$0xff]   ;;  %v2942_v22 = vmov 1983009808   ;;  %v46_v24 = vlaneseq }
  0x14   :  { %v2694_v1 = vld [vmem:[#allocation2 + $0xc0] sm:$0xff]   ;;  %2424 = vmatprep.subr.bf16.mxu0 %v2693_v0  ;;  %v2698_v5 = vld [vmem:[#allocation2 + $0xc8] sm:$0xff]   ;;  %v2701_v8 = vld [vmem:[#allocation2 + $0x50] sm:$0xff]   ;;  %v44_v23 = vunpack.c.l.s4 %v2942_v22 }
  0x15   :  { %v2695_v2 = vld [vmem:[#allocation2] sm:$0xff]   ;;  %2446 = vmatprep.subr.bf16.mxu1 %v2694_v1  ;;  %v2699_v6 = vld [vmem:[#allocation2 + $0x8] sm:$0xff]   ;;  %v2702_v9 = vld [vmem:[#allocation2 + $0xd0] sm:$0xff]   ;;  %v47_v30 = vshrl.u32 %v46_v24, 7 }
  0x16   :  { %v2696_v3 = vld [vmem:[#allocation2 + $0x80] sm:$0xff]   ;;  %2425 = vmatpush3.bf16.msra.mxu0 %v2695_v2  ;;  %v2700_v7 = vld [vmem:[#allocation2 + $0x88] sm:$0xff]   ;;  %v2703_v10 = vld [vmem:[#allocation2 + $0x10] sm:$0xff]   ;;  %v45_v29 = vunpack.c.0.s8 %v44_v23 }
  0x17   :  { %2447 = vmatpush3.bf16.msra.mxu1 %v2696_v3  ;;  %2426 = vmatprep.subr.bf16.mxu0 %v2697_v4  ;;  %v2704_v11 = vld [vmem:[#allocation2 + $0x90] sm:$0xff]   ;;  %v2705_v12 = vld [vmem:[#allocation2 + $0x58] sm:$0xff]   ;;  %v2709_v16 = vld [vmem:[#allocation2 + $0x60] sm:$0xff]  }
  0x18   :  { %2448 = vmatprep.subr.bf16.mxu1 %v2698_v5  ;;  %v2706_v13 = vld [vmem:[#allocation2 + $0xd8] sm:$0xff]   ;;  %v2710_v17 = vld [vmem:[#allocation2 + $0xe0] sm:$0xff]   ;;  %v2713_v20 = vld [vmem:[#allocation2 + $0x68] sm:$0xff]   ;;  %v2976_v35 = vsub.s32 %v45_v29, %v47_v30 }
  0x19   :  { %v2707_v14 = vld [vmem:[#allocation2 + $0x18] sm:$0xff]   ;;  %v2711_v18 = vld [vmem:[#allocation2 + $0x20] sm:$0xff]   ;;  %v2714_v21 = vld [vmem:[#allocation2 + $0xe8] sm:$0xff]  }
  0x1a   :  { %2427 = vmatpush3.bf16.msra.mxu0 %v2699_v6  ;;  %v2708_v15 = vld [vmem:[#allocation2 + $0x98] sm:$0xff]   ;;  %v2712_v19 = vld [vmem:[#allocation2 + $0xa0] sm:$0xff]   ;;  %v2715_v25 = vld [vmem:[#allocation2 + $0x28] sm:$0xff]  }
  0x1b   :  { %2449 = vmatpush3.bf16.msra.mxu1 %v2700_v7  ;;  %2428 = vmatprep.subr.bf16.mxu0 %v2701_v8  ;;  %v2716_v26 = vld [vmem:[#allocation2 + $0xa8] sm:$0xff]   ;;  %v2717_v27 = vld [vmem:[#allocation2 + $0x70] sm:$0xff]   ;;  %v2721_v33 = vld [vmem:[#allocation2 + $0x78] sm:$0xff]  }
  0x1c   :  { %2450 = vmatprep.subr.bf16.mxu1 %v2702_v9  ;;  %v2718_v28 = vld [vmem:[#allocation2 + $0xf0] sm:$0xff]   ;;  %v2722_v34 = vld [vmem:[#allocation2 + $0xf8] sm:$0xff]   ;;  %v30_v38 = vld [vmem:[%s3023_s0] sm:$0xff] }
  0x1d   :  { %v2719_v31 = vld [vmem:[#allocation2 + $0x30] sm:$0xff]   ;;  %v2723_v36 = vld [vmem:[#allocation2 + $0x38] sm:$0xff]   ;;  %v49_v39 = vrot.slane %v30_v38, %v2976_v35  ;;  %v42_v40 = vcombine.high %v30_v38, %v30_v38  ;;  %v2726_v41 = vld [vmem:[#allocation2 + $0x140] sm:$0xff]  }
  0x1e   :  { %2429 = vmatpush3.bf16.msra.mxu0 %v2703_v10  ;;  %v2720_v32 = vld [vmem:[#allocation2 + $0xb0] sm:$0xff]   ;;  %v2724_v37 = vld [vmem:[#allocation2 + $0xb8] sm:$0xff]   ;;  %v2727_v42 = vld [vmem:[#allocation2 + $0x1c0] sm:$0xff]  }
  0x1f   :  { %2451 = vmatpush3.bf16.msra.mxu1 %v2704_v11  ;;  %2430 = vmatprep.subr.bf16.mxu0 %v2705_v12  ;;  %v57_v43 = vcombine.high %v49_v39, %v49_v39  ;;  %v56_v44 = vrot.slane %v42_v40, %v2976_v35  ;;  %v168_v45 = vpack.c.bf16 %v49_v39, %v49_v39  ;;  %v2728_v46 = vld [vmem:[#allocation2 + $0x100] sm:$0xff]   ;;  %v2730_v51 = vld [vmem:[#allocation2 + $0x148] sm:$0xff]   ;;  %v2734_v56 = vld [vmem:[#allocation2 + $0x150] sm:$0xff]  }
  0x20   :  { %2452 = vmatprep.subr.bf16.mxu1 %v2706_v13  ;;  %v2729_v49 = vld [vmem:[#allocation2 + $0x180] sm:$0xff]   ;;  %v2731_v53 = vld [vmem:[#allocation2 + $0x1c8] sm:$0xff]   ;;  %v2735_v57 = vld [vmem:[#allocation2 + $0x1d0] sm:$0xff]  }
  0x21   :  { %v169_v47 = vpack.c.bf16 %v57_v43, %v57_v43  ;;  %v58_v48 = vcombine.high %v56_v44, %v56_v44  ;;  %v170_v50 = vpack.c.bf16 %v56_v44, %v56_v44  ;;  %v2732_v54 = vld [vmem:[#allocation2 + $0x108] sm:$0xff]   ;;  %v2736_v58 = vld [vmem:[#allocation2 + $0x110] sm:$0xff]   ;;  %v2738_v60 = vld [vmem:[#allocation2 + $0x158] sm:$0xff]  }
  0x22   :  { %2431 = vmatpush3.bf16.msra.mxu0 %v2707_v14  ;;  %v2733_v55 = vld [vmem:[#allocation2 + $0x188] sm:$0xff]   ;;  %v2737_v59 = vld [vmem:[#allocation2 + $0x190] sm:$0xff]   ;;  %v2739_v61 = vld [vmem:[#allocation2 + $0x1d8] sm:$0xff]  }
  0x23   :  { %2453 = vmatpush3.bf16.msra.mxu1 %v2708_v15  ;;  %2432 = vmatprep.subr.bf16.mxu0 %v2709_v16  ;;  %v171_v52 = vpack.c.bf16 %v58_v48, %v58_v48  ;;  %v2740_v62 = vld [vmem:[#allocation2 + $0x118] sm:$0xff]   ;;  %v2742_v0 = vld [vmem:[#allocation2 + $0x160] sm:$0xff]   ;;  %v2746_v4 = vld [vmem:[#allocation2 + $0x168] sm:$0xff]  }
  0x24   :  { %2454 = vmatprep.subr.bf16.mxu1 %v2710_v17  ;;  %1767 = vmatprep.mubr.bf16.mxu0 %v169_v47  ;;  %v2741_v63 = vld [vmem:[#allocation2 + $0x198] sm:$0xff]   ;;  %v2743_v1 = vld [vmem:[#allocation2 + $0x1e0] sm:$0xff]   ;;  %v2747_v5 = vld [vmem:[#allocation2 + $0x1e8] sm:$0xff]  }
  0x25   :  { %1807 = vmatprep.mubr.bf16.mxu1 %v171_v52  ;;  %v2744_v2 = vld [vmem:[#allocation2 + $0x120] sm:$0xff]   ;;  %v2748_v6 = vld [vmem:[#allocation2 + $0x128] sm:$0xff]   ;;  %v2750_v8 = vld [vmem:[#allocation2 + $0x170] sm:$0xff]  }
  0x26   :  { %2433 = vmatpush3.bf16.msra.mxu0 %v2711_v18  ;;  %v2745_v3 = vld [vmem:[#allocation2 + $0x1a0] sm:$0xff]   ;;  %v2749_v7 = vld [vmem:[#allocation2 + $0x1a8] sm:$0xff]   ;;  %v2751_v9 = vld [vmem:[#allocation2 + $0x1f0] sm:$0xff]  }
  0x27   :  { %2455 = vmatpush3.bf16.msra.mxu1 %v2712_v19  ;;  %2434 = vmatprep.subr.bf16.mxu0 %v2713_v20  ;;  %v2752_v10 = vld [vmem:[#allocation2 + $0x130] sm:$0xff]   ;;  %v2754_v12 = vld [vmem:[#allocation2 + $0x178] sm:$0xff]   ;;  %v31_v15 = vld [vmem:[%s3023_s0 + $0x8] sm:$0xff] }
  0x28   :  { %2456 = vmatprep.subr.bf16.mxu1 %v2714_v21  ;;  %v2753_v11 = vld [vmem:[#allocation2 + $0x1b0] sm:$0xff]   ;;  %v2755_v13 = vld [vmem:[#allocation2 + $0x1f8] sm:$0xff]   ;;  %v66_v17 = vrot.slane %v31_v15, %v2976_v35  ;;  %v59_v18 = vcombine.high %v31_v15, %v31_v15  ;;  %v2759_v19 = vld [vmem:[#allocation2 + $0x240] sm:$0xff]  }
  0x29   :  { %v2756_v14 = vld [vmem:[#allocation2 + $0x138] sm:$0xff]   ;;  %v2760_v22 = vld [vmem:[#allocation2 + $0x2c0] sm:$0xff]   ;;  %v2763_v29 = vld [vmem:[#allocation2 + $0x248] sm:$0xff]  }
  0x2a   :  { %2435 = vmatpush3.bf16.msra.mxu0 %v2715_v25  ;;  %v2757_v16 = vld [vmem:[#allocation2 + $0x1b8] sm:$0xff]   ;;  %v74_v20 = vcombine.high %v66_v17, %v66_v17  ;;  %v73_v21 = vrot.slane %v59_v18, %v2976_v35  ;;  %v172_v23 = vpack.c.bf16 %v66_v17, %v66_v17  ;;  %v2761_v24 = vld [vmem:[#allocation2 + $0x200] sm:$0xff]   ;;  %v2770_v38 = vld [vmem:[#allocation2 + $0x290] sm:$0xff]  }
  0x2b   :  { %2457 = vmatpush3.bf16.msra.mxu1 %v2716_v26  ;;  %2436 = vmatprep.subr.bf16.mxu0 %v2717_v27  ;;  %v2762_v27 = vld [vmem:[#allocation2 + $0x280] sm:$0xff]   ;;  %v2771_v39 = vld [vmem:[#allocation2 + $0x258] sm:$0xff]   ;;  %v2779_v47 = vld [vmem:[#allocation2 + $0x268] sm:$0xff]  }
  0x2c   :  { %2458 = vmatprep.subr.bf16.mxu1 %v2718_v28  ;;  %v173_v25 = vpack.c.bf16 %v74_v20, %v74_v20  ;;  %v75_v26 = vcombine.high %v73_v21, %v73_v21  ;;  %v174_v28 = vpack.c.bf16 %v73_v21, %v73_v21  ;;  %v2772_v40 = vld [vmem:[#allocation2 + $0x2d8] sm:$0xff]   ;;  %v2775_v43 = vld [vmem:[#allocation2 + $0x260] sm:$0xff]   ;;  %v2780_v48 = vld [vmem:[#allocation2 + $0x2e8] sm:$0xff]  }
  0x2d   :  { %v2776_v44 = vld [vmem:[#allocation2 + $0x2e0] sm:$0xff]   ;;  %v2784_v52 = vld [vmem:[#allocation2 + $0x2f0] sm:$0xff]   ;;  %v2804_v17 = vld [vmem:[#allocation2 + $0x358] sm:$0xff]  }
  0x2e   :  { %2437 = vmatpush3.bf16.msra.mxu0 %v2719_v31  ;;  %v175_v30 = vpack.c.bf16 %v75_v26, %v75_v26  ;;  %v2764_v31 = vld [vmem:[#allocation2 + $0x2c8] sm:$0xff]   ;;  %v2802_v15 = vld [vmem:[#allocation2 + $0x310] sm:$0xff]   ;;  %v2805_v18 = vld [vmem:[#allocation2 + $0x3d8] sm:$0xff]  }
  0x2f   :  { %2459 = vmatpush3.bf16.msra.mxu1 %v2720_v32  ;;  %2438 = vmatprep.subr.bf16.mxu0 %v2721_v33  ;;  %v2765_v32 = vld [vmem:[#allocation2 + $0x208] sm:$0xff]   ;;  %v2807_v20 = vld [vmem:[#allocation2 + $0x398] sm:$0xff]   ;;  %v2808_v21 = vld [vmem:[#allocation2 + $0x360] sm:$0xff]  }
  0x30   :  { %2460 = vmatprep.subr.bf16.mxu1 %v2722_v34  ;;  %v2766_v33 = vld [vmem:[#allocation2 + $0x288] sm:$0xff]   ;;  %v2767_v34 = vld [vmem:[#allocation2 + $0x250] sm:$0xff]  }
  0x31   :  { %v2813_v26 = vld [vmem:[#allocation2 + $0x3e8] sm:$0xff]  }
  0x32   :  { %2439 = vmatpush3.bf16.msra.mxu0 %v2723_v36  ;;  %v2768_v36 = vld [vmem:[#allocation2 + $0x2d0] sm:$0xff]  }
  0x33   :  { %2461 = vmatpush3.bf16.msra.mxu1 %v2724_v37  ;;  %2468 = vmatprep.subr.bf16.mxu0 %v2726_v41  ;;  %v2769_v37 = vld [vmem:[#allocation2 + $0x210] sm:$0xff]   ;;  %v2773_v41 = vld [vmem:[#allocation2 + $0x218] sm:$0xff]  }
  0x34   :  { %2490 = vmatprep.subr.bf16.mxu1 %v2727_v42  ;;  %v2774_v42 = vld [vmem:[#allocation2 + $0x298] sm:$0xff]  }
  0x35   :  { %1768 = vmatmul.mubr.bf16.vlgmr.msra.gmra.mrb[0].mxu0 %v168_v45  ;;  %v2777_v45 = vld [vmem:[#allocation2 + $0x220] sm:$0xff]  }
  0x36   :  { %2469 = vmatpush3.bf16.msra.mxu0 %v2728_v46  ;;  %1808 = vmatmul.mubr.bf16.vlgmr.msra.gmra.mrb[0].mxu1 %v170_v50  ;;  %v2778_v46 = vld [vmem:[#allocation2 + $0x2a0] sm:$0xff]   ;;  %v2782_v50 = vld [vmem:[#allocation2 + $0x2a8] sm:$0xff]  }
  0x37   :  { %2470 = vmatprep.subr.bf16.mxu0 %v2730_v51  ;;  %2491 = vmatpush3.bf16.msra.mxu1 %v2729_v49  ;;  %v2781_v49 = vld [vmem:[#allocation2 + $0x228] sm:$0xff]   ;;  %v2783_v51 = vld [vmem:[#allocation2 + $0x270] sm:$0xff]  }
  0x38   :  { %2492 = vmatprep.subr.bf16.mxu1 %v2731_v53  ;;  %1847 = vmatprep.mubr.bf16.mxu0 %v173_v25  ;;  %v2785_v53 = vld [vmem:[#allocation2 + $0x230] sm:$0xff]   ;;  %v2812_v25 = vld [vmem:[#allocation2 + $0x368] sm:$0xff]  }
  0x39   :  { %1887 = vmatprep.mubr.bf16.mxu1 %v175_v30  ;;  %v2817_v30 = vld [vmem:[#allocation2 + $0x3f0] sm:$0xff]  }
  0x3a   :  { %2471 = vmatpush3.bf16.msra.mxu0 %v2732_v54  ;;  %v2786_v54 = vld [vmem:[#allocation2 + $0x2b0] sm:$0xff]  }
  0x3b   :  { %2472 = vmatprep.subr.bf16.mxu0 %v2734_v56  ;;  %2493 = vmatpush3.bf16.msra.mxu1 %v2733_v55  ;;  %v2787_v55 = vld [vmem:[#allocation2 + $0x278] sm:$0xff]  }
  0x3c   :  { %2494 = vmatprep.subr.bf16.mxu1 %v2735_v57  ;;  %v2788_v56 = vld [vmem:[#allocation2 + $0x2f8] sm:$0xff]  }
  0x3d   :  { %v2789_v57 = vld [vmem:[#allocation2 + $0x238] sm:$0xff]  }
  0x3e   :  { %2473 = vmatpush3.bf16.msra.mxu0 %v2736_v58  ;;  %v32_v58 = vld [vmem:[%s3023_s0 + $0x10] sm:$0xff] }
  0x3f   :  { %2474 = vmatprep.subr.bf16.mxu0 %v2738_v60  ;;  %2495 = vmatpush3.bf16.msra.mxu1 %v2737_v59  ;;  %v2790_v59 = vld [vmem:[#allocation2 + $0x2b8] sm:$0xff]   ;;  %v83_v60 = vrot.slane %v32_v58, %v2976_v35 }
  0x40   :  { %2496 = vmatprep.subr.bf16.mxu1 %v2739_v61  ;;  %v76_v61 = vcombine.high %v32_v58, %v32_v58  ;;  %v2835_v58 = vld [vmem:[#allocation2 + $0x410] sm:$0xff]  }
  0x42   :  { %2475 = vmatpush3.bf16.msra.mxu0 %v2740_v62  ;;  %v2792_v62 = vld [vmem:[#allocation2 + $0x340] sm:$0xff]  }
  0x43   :  { %2476 = vmatprep.subr.bf16.mxu0 %v2742_v0  ;;  %2497 = vmatpush3.bf16.msra.mxu1 %v2741_v63  ;;  %v91_v63 = vcombine.high %v83_v60, %v83_v60  ;;  %v90_v0 = vrot.slane %v76_v61, %v2976_v35  ;;  %v2838_v61 = vld [vmem:[#allocation2 + $0x4d8] sm:$0xff]  }
  0x44   :  { %2498 = vmatprep.subr.bf16.mxu1 %v2743_v1  ;;  %v2793_v1 = vld [vmem:[#allocation2 + $0x3c0] sm:$0xff]  }
  0x46   :  { %2477 = vmatpush3.bf16.msra.mxu0 %v2744_v2  ;;  %v176_v2 = vpack.c.bf16 %v83_v60, %v83_v60  ;;  %v2836_v60 = vld [vmem:[#allocation2 + $0x490] sm:$0xff]  }
  0x47   :  { %2478 = vmatprep.subr.bf16.mxu0 %v2746_v4  ;;  %2499 = vmatpush3.bf16.msra.mxu1 %v2745_v3  ;;  %v2794_v3 = vld [vmem:[#allocation2 + $0x300] sm:$0xff]   ;;  %v177_v4 = vpack.c.bf16 %v91_v63, %v91_v63 }
  0x48   :  { %2500 = vmatprep.subr.bf16.mxu1 %v2747_v5  ;;  %v92_v5 = vcombine.high %v90_v0, %v90_v0  ;;  %v2841_v63 = vld [vmem:[#allocation2 + $0x460] sm:$0xff]  }
  0x4a   :  { %2479 = vmatpush3.bf16.msra.mxu0 %v2748_v6  ;;  %v2795_v6 = vld [vmem:[#allocation2 + $0x380] sm:$0xff]  }
  0x4b   :  { %2480 = vmatprep.subr.bf16.mxu0 %v2750_v8  ;;  %2501 = vmatpush3.bf16.msra.mxu1 %v2749_v7  ;;  %v178_v7 = vpack.c.bf16 %v90_v0, %v90_v0  ;;  %v2796_v8 = vld [vmem:[#allocation2 + $0x348] sm:$0xff]   ;;  %v2840_v0 = vld [vmem:[#allocation2 + $0x498] sm:$0xff]  }
  0x4c   :  { %2502 = vmatprep.subr.bf16.mxu1 %v2751_v9  ;;  %v179_v9 = vpack.c.bf16 %v92_v5, %v92_v5  ;;  %v2846_v5 = vld [vmem:[#allocation2 + $0x4e8] sm:$0xff]  }
  0x4e   :  { %2481 = vmatpush3.bf16.msra.mxu0 %v2752_v10  ;;  %v2797_v10 = vld [vmem:[#allocation2 + $0x3c8] sm:$0xff]  }
  0x4f   :  { %2482 = vmatprep.subr.bf16.mxu0 %v2754_v12  ;;  %2503 = vmatpush3.bf16.msra.mxu1 %v2753_v11  ;;  %v2798_v11 = vld [vmem:[#allocation2 + $0x308] sm:$0xff]  }
  0x50   :  { %2504 = vmatprep.subr.bf16.mxu1 %v2755_v13  ;;  %v2799_v12 = vld [vmem:[#allocation2 + $0x388] sm:$0xff]   ;;  %v2800_v13 = vld [vmem:[#allocation2 + $0x350] sm:$0xff]  }
  0x52   :  { %2483 = vmatpush3.bf16.msra.mxu0 %v2756_v14  ;;  %v2801_v14 = vld [vmem:[#allocation2 + $0x3d0] sm:$0xff]  }
  0x53   :  { %2512 = vmatprep.subr.bf16.mxu0 %v2759_v19  ;;  %2505 = vmatpush3.bf16.msra.mxu1 %v2757_v16  ;;  %v2803_v16 = vld [vmem:[#allocation2 + $0x390] sm:$0xff]   ;;  %v2806_v19 = vld [vmem:[#allocation2 + $0x318] sm:$0xff]  }
  0x54   :  { %2534 = vmatprep.subr.bf16.mxu1 %v2760_v22  ;;  %v2809_v22 = vld [vmem:[#allocation2 + $0x3e0] sm:$0xff]  }
  0x55   :  { %1848 = vmatmul.mubr.bf16.vlgmr.msra.gmra.mrb[4].mxu0 %v172_v23  ;;  %v2810_v23 = vld [vmem:[#allocation2 + $0x320] sm:$0xff]  }
  0x56   :  { %2513 = vmatpush3.bf16.msra.mxu0 %v2761_v24  ;;  %1888 = vmatmul.mubr.bf16.vlgmr.msra.gmra.mrb[4].mxu1 %v174_v28  ;;  %v2811_v24 = vld [vmem:[#allocation2 + $0x3a0] sm:$0xff]   ;;  %v2815_v28 = vld [vmem:[#allocation2 + $0x3a8] sm:$0xff]  }
  0x57   :  { %2514 = vmatprep.subr.bf16.mxu0 %v2763_v29  ;;  %2535 = vmatpush3.bf16.msra.mxu1 %v2762_v27  ;;  %v2814_v27 = vld [vmem:[#allocation2 + $0x328] sm:$0xff]   ;;  %v2816_v29 = vld [vmem:[#allocation2 + $0x370] sm:$0xff]  }
  0x58   :  { %2536 = vmatprep.subr.bf16.mxu1 %v2764_v31  ;;  %1927 = vmatprep.mubr.bf16.mxu0 %v177_v4  ;;  %v2818_v31 = vld [vmem:[#allocation2 + $0x330] sm:$0xff]   ;;  %v2844_v4 = vld [vmem:[#allocation2 + $0x4a0] sm:$0xff]  }
  0x59   :  { %1967 = vmatprep.mubr.bf16.mxu1 %v179_v9  ;;  %v2850_v9 = vld [vmem:[#allocation2 + $0x4f0] sm:$0xff]  }
  0x5a   :  { %2515 = vmatpush3.bf16.msra.mxu0 %v2765_v32  ;;  %v2819_v32 = vld [vmem:[#allocation2 + $0x3b0] sm:$0xff]  }
  0x5b   :  { %2516 = vmatprep.subr.bf16.mxu0 %v2767_v34  ;;  %2537 = vmatpush3.bf16.msra.mxu1 %v2766_v33  ;;  %v2820_v33 = vld [vmem:[#allocation2 + $0x378] sm:$0xff]  }
  0x5c   :  { %2538 = vmatprep.subr.bf16.mxu1 %v2768_v36  ;;  %v2821_v34 = vld [vmem:[#allocation2 + $0x3f8] sm:$0xff]  }
  0x5d   :  { %v2822_v36 = vld [vmem:[#allocation2 + $0x338] sm:$0xff]  }
  0x5e   :  { %2517 = vmatpush3.bf16.msra.mxu0 %v2769_v37  ;;  %v33_v37 = vld [vmem:[%s3023_s0 + $0x18] sm:$0xff] }
  0x5f   :  { %2518 = vmatprep.subr.bf16.mxu0 %v2771_v39  ;;  %2539 = vmatpush3.bf16.msra.mxu1 %v2770_v38  ;;  %v100_v38 = vrot.slane %v33_v37, %v2976_v35  ;;  %v93_v39 = vcombine.high %v33_v37, %v33_v37  ;;  %v2868_v37 = vld [vmem:[#allocation2 + $0x510] sm:$0xff]  }
  0x60   :  { %2540 = vmatprep.subr.bf16.mxu1 %v2772_v40  ;;  %v2825_v40 = vld [vmem:[#allocation2 + $0x440] sm:$0xff]  }
  0x62   :  { %2519 = vmatpush3.bf16.msra.mxu0 %v2773_v41  ;;  %v2823_v41 = vld [vmem:[#allocation2 + $0x3b8] sm:$0xff]  }
  0x63   :  { %2520 = vmatprep.subr.bf16.mxu0 %v2775_v43  ;;  %2541 = vmatpush3.bf16.msra.mxu1 %v2774_v42  ;;  %v108_v42 = vcombine.high %v100_v38, %v100_v38  ;;  %v107_v43 = vrot.slane %v93_v39, %v2976_v35  ;;  %v2869_v39 = vld [vmem:[#allocation2 + $0x590] sm:$0xff]  }
  0x64   :  { %2542 = vmatprep.subr.bf16.mxu1 %v2776_v44  ;;  %v2826_v44 = vld [vmem:[#allocation2 + $0x4c0] sm:$0xff]  }
  0x66   :  { %2521 = vmatpush3.bf16.msra.mxu0 %v2777_v45  ;;  %v180_v45 = vpack.c.bf16 %v100_v38, %v100_v38  ;;  %v2870_v38 = vld [vmem:[#allocation2 + $0x558] sm:$0xff]  }
  0x67   :  { %2522 = vmatprep.subr.bf16.mxu0 %v2779_v47  ;;  %2543 = vmatpush3.bf16.msra.mxu1 %v2778_v46  ;;  %v181_v46 = vpack.c.bf16 %v108_v42, %v108_v42  ;;  %v109_v47 = vcombine.high %v107_v43, %v107_v43  ;;  %v2874_v42 = vld [vmem:[#allocation2 + $0x560] sm:$0xff]  }
  0x68   :  { %2544 = vmatprep.subr.bf16.mxu1 %v2780_v48  ;;  %v2827_v48 = vld [vmem:[#allocation2 + $0x400] sm:$0xff]  }
  0x6a   :  { %2523 = vmatpush3.bf16.msra.mxu0 %v2781_v49  ;;  %v182_v49 = vpack.c.bf16 %v107_v43, %v107_v43  ;;  %v2873_v43 = vld [vmem:[#allocation2 + $0x598] sm:$0xff]  }
  0x6b   :  { %2524 = vmatprep.subr.bf16.mxu0 %v2783_v51  ;;  %2545 = vmatpush3.bf16.msra.mxu1 %v2782_v50  ;;  %v2829_v50 = vld [vmem:[#allocation2 + $0x448] sm:$0xff]   ;;  %v183_v51 = vpack.c.bf16 %v109_v47, %v109_v47  ;;  %v2877_v47 = vld [vmem:[#allocation2 + $0x5a0] sm:$0xff]  }
  0x6c   :  { %2546 = vmatprep.subr.bf16.mxu1 %v2784_v52  ;;  %v2828_v52 = vld [vmem:[#allocation2 + $0x480] sm:$0xff]  }
  0x6e   :  { %2525 = vmatpush3.bf16.msra.mxu0 %v2785_v53  ;;  %v2830_v53 = vld [vmem:[#allocation2 + $0x4c8] sm:$0xff]  }
  0x6f   :  { %2526 = vmatprep.subr.bf16.mxu0 %v2787_v55  ;;  %2547 = vmatpush3.bf16.msra.mxu1 %v2786_v54  ;;  %v2831_v54 = vld [vmem:[#allocation2 + $0x408] sm:$0xff]   ;;  %v2833_v55 = vld [vmem:[#allocation2 + $0x450] sm:$0xff]  }
  0x70   :  { %2548 = vmatprep.subr.bf16.mxu1 %v2788_v56  ;;  %v2832_v56 = vld [vmem:[#allocation2 + $0x488] sm:$0xff]  }
  0x72   :  { %2527 = vmatpush3.bf16.msra.mxu0 %v2789_v57  ;;  %v2834_v57 = vld [vmem:[#allocation2 + $0x4d0] sm:$0xff]  }
  0x73   :  { %2556 = vmatprep.subr.bf16.mxu0 %v2792_v62  ;;  %2549 = vmatpush3.bf16.msra.mxu1 %v2790_v59  ;;  %v2837_v59 = vld [vmem:[#allocation2 + $0x458] sm:$0xff]  }
  0x74   :  { %2578 = vmatprep.subr.bf16.mxu1 %v2793_v1  ;;  %v2839_v62 = vld [vmem:[#allocation2 + $0x418] sm:$0xff]   ;;  %v2842_v1 = vld [vmem:[#allocation2 + $0x4e0] sm:$0xff]  }
  0x75   :  { %1928 = vmatmul.mubr.bf16.vlgmr.msra.gmra.mrb[8].mxu0 %v176_v2  ;;  %v2843_v2 = vld [vmem:[#allocation2 + $0x420] sm:$0xff]  }
  0x76   :  { %2557 = vmatpush3.bf16.msra.mxu0 %v2794_v3  ;;  %1968 = vmatmul.mubr.bf16.vlgmr.msra.gmra.mrb[8].mxu1 %v178_v7  ;;  %v2845_v3 = vld [vmem:[#allocation2 + $0x468] sm:$0xff]   ;;  %v2849_v7 = vld [vmem:[#allocation2 + $0x470] sm:$0xff]  }
  0x77   :  { %2558 = vmatprep.subr.bf16.mxu0 %v2796_v8  ;;  %2579 = vmatpush3.bf16.msra.mxu1 %v2795_v6  ;;  %v2847_v6 = vld [vmem:[#allocation2 + $0x428] sm:$0xff]  }
  0x78   :  { %2580 = vmatprep.subr.bf16.mxu1 %v2797_v10  ;;  %2007 = vmatprep.mubr.bf16.mxu0 %v181_v46  ;;  %v2848_v8 = vld [vmem:[#allocation2 + $0x4a8] sm:$0xff]   ;;  %v2851_v10 = vld [vmem:[#allocation2 + $0x430] sm:$0xff]  }
  0x79   :  { %2047 = vmatprep.mubr.bf16.mxu1 %v183_v51  ;;  %v2878_v46 = vld [vmem:[#allocation2 + $0x568] sm:$0xff]  }
  0x7a   :  { %2559 = vmatpush3.bf16.msra.mxu0 %v2798_v11  ;;  %v2853_v11 = vld [vmem:[#allocation2 + $0x478] sm:$0xff]   ;;  %v2881_v51 = vld [vmem:[#allocation2 + $0x5a8] sm:$0xff]  }
  0x7b   :  { %2560 = vmatprep.subr.bf16.mxu0 %v2800_v13  ;;  %2581 = vmatpush3.bf16.msra.mxu1 %v2799_v12  ;;  %v2852_v12 = vld [vmem:[#allocation2 + $0x4b0] sm:$0xff]   ;;  %v2854_v13 = vld [vmem:[#allocation2 + $0x4f8] sm:$0xff]  }
  0x7c   :  { %2582 = vmatprep.subr.bf16.mxu1 %v2801_v14  ;;  %v34_v14 = vld [vmem:[%s3023_s0 + $0x20] sm:$0xff] }
  0x7e   :  { %2561 = vmatpush3.bf16.msra.mxu0 %v2802_v15  ;;  %v2855_v15 = vld [vmem:[#allocation2 + $0x438] sm:$0xff]  }
  0x7f   :  { %2562 = vmatprep.subr.bf16.mxu0 %v2804_v17  ;;  %2583 = vmatpush3.bf16.msra.mxu1 %v2803_v16  ;;  %v117_v16 = vrot.slane %v34_v14, %v2976_v35  ;;  %v110_v17 = vcombine.high %v34_v14, %v34_v14 }
  0x80   :  { %2584 = vmatprep.subr.bf16.mxu1 %v2805_v18  ;;  %v2858_v18 = vld [vmem:[#allocation2 + $0x540] sm:$0xff]  }
  0x82   :  { %2563 = vmatpush3.bf16.msra.mxu0 %v2806_v19  ;;  %v2856_v19 = vld [vmem:[#allocation2 + $0x4b8] sm:$0xff]  }
  0x83   :  { %2564 = vmatprep.subr.bf16.mxu0 %v2808_v21  ;;  %2585 = vmatpush3.bf16.msra.mxu1 %v2807_v20  ;;  %v125_v20 = vcombine.high %v117_v16, %v117_v16  ;;  %v124_v21 = vrot.slane %v110_v17, %v2976_v35 }
  0x84   :  { %2586 = vmatprep.subr.bf16.mxu1 %v2809_v22  ;;  %v184_v22 = vpack.c.bf16 %v117_v16, %v117_v16 }
  0x86   :  { %2565 = vmatpush3.bf16.msra.mxu0 %v2810_v23  ;;  %v2859_v23 = vld [vmem:[#allocation2 + $0x5c0] sm:$0xff]  }
  0x87   :  { %2566 = vmatprep.subr.bf16.mxu0 %v2812_v25  ;;  %2587 = vmatpush3.bf16.msra.mxu1 %v2811_v24  ;;  %v185_v24 = vpack.c.bf16 %v125_v20, %v125_v20  ;;  %v126_v25 = vcombine.high %v124_v21, %v124_v21 }
  0x88   :  { %2588 = vmatprep.subr.bf16.mxu1 %v2813_v26  ;;  %v2860_v26 = vld [vmem:[#allocation2 + $0x500] sm:$0xff]  }
  0x8a   :  { %2567 = vmatpush3.bf16.msra.mxu0 %v2814_v27  ;;  %v186_v27 = vpack.c.bf16 %v124_v21, %v124_v21 }
  0x8b   :  { %2568 = vmatprep.subr.bf16.mxu0 %v2816_v29  ;;  %2589 = vmatpush3.bf16.msra.mxu1 %v2815_v28  ;;  %v2862_v28 = vld [vmem:[#allocation2 + $0x548] sm:$0xff]   ;;  %v187_v29 = vpack.c.bf16 %v126_v25, %v126_v25 }
  0x8c   :  { %2590 = vmatprep.subr.bf16.mxu1 %v2817_v30  ;;  %v2861_v30 = vld [vmem:[#allocation2 + $0x580] sm:$0xff]  }
  0x8e   :  { %2569 = vmatpush3.bf16.msra.mxu0 %v2818_v31  ;;  %v2863_v31 = vld [vmem:[#allocation2 + $0x5c8] sm:$0xff]  }
  0x8f   :  { %2570 = vmatprep.subr.bf16.mxu0 %v2820_v33  ;;  %2591 = vmatpush3.bf16.msra.mxu1 %v2819_v32  ;;  %v2864_v32 = vld [vmem:[#allocation2 + $0x508] sm:$0xff]   ;;  %v2866_v33 = vld [vmem:[#allocation2 + $0x550] sm:$0xff]  }
  0x90   :  { %2592 = vmatprep.subr.bf16.mxu1 %v2821_v34  ;;  %v2865_v34 = vld [vmem:[#allocation2 + $0x588] sm:$0xff]  }
  0x92   :  { %2571 = vmatpush3.bf16.msra.mxu0 %v2822_v36  ;;  %v2867_v36 = vld [vmem:[#allocation2 + $0x5d0] sm:$0xff]  }
  0x93   :  { %2600 = vmatprep.subr.bf16.mxu0 %v2825_v40  ;;  %2593 = vmatpush3.bf16.msra.mxu1 %v2823_v41  ;;  %v2871_v40 = vld [vmem:[#allocation2 + $0x5d8] sm:$0xff]  }
  0x94   :  { %2622 = vmatprep.subr.bf16.mxu1 %v2826_v44  ;;  %v2872_v41 = vld [vmem:[#allocation2 + $0x518] sm:$0xff]   ;;  %v2875_v44 = vld [vmem:[#allocation2 + $0x5e0] sm:$0xff]  }
  0x95   :  { %2008 = vmatmul.mubr.bf16.vlgmr.msra.gmra.mrb[12].mxu0 %v180_v45  ;;  %v2876_v45 = vld [vmem:[#allocation2 + $0x520] sm:$0xff]  }
  0x96   :  { %2601 = vmatpush3.bf16.msra.mxu0 %v2827_v48  ;;  %2048 = vmatmul.mubr.bf16.vlgmr.msra.gmra.mrb[12].mxu1 %v182_v49  ;;  %v2879_v48 = vld [vmem:[#allocation2 + $0x5e8] sm:$0xff]  }
  0x97   :  { %2602 = vmatprep.subr.bf16.mxu0 %v2829_v50  ;;  %2623 = vmatpush3.bf16.msra.mxu1 %v2828_v52  ;;  %v2880_v49 = vld [vmem:[#allocation2 + $0x528] sm:$0xff]   ;;  %v2882_v50 = vld [vmem:[#allocation2 + $0x570] sm:$0xff]  }
  0x98   :  { %2624 = vmatprep.subr.bf16.mxu1 %v2830_v53  ;;  %2087 = vmatprep.mubr.bf16.mxu0 %v185_v24  ;;  %v2883_v52 = vld [vmem:[#allocation2 + $0x5f0] sm:$0xff]  }
  0x99   :  { %2127 = vmatprep.mubr.bf16.mxu1 %v187_v29  ;;  %v2884_v53 = vld [vmem:[#allocation2 + $0x530] sm:$0xff]  }
  0x9a   :  { %2603 = vmatpush3.bf16.msra.mxu0 %v2831_v54  ;;  %v2886_v54 = vld [vmem:[#allocation2 + $0x578] sm:$0xff]  }
  0x9b   :  { %2604 = vmatprep.subr.bf16.mxu0 %v2833_v55  ;;  %2625 = vmatpush3.bf16.msra.mxu1 %v2832_v56  ;;  %v2885_v55 = vld [vmem:[#allocation2 + $0x5b0] sm:$0xff]   ;;  %v2887_v56 = vld [vmem:[#allocation2 + $0x5f8] sm:$0xff]  }
  0x9c   :  { %2626 = vmatprep.subr.bf16.mxu1 %v2834_v57  ;;  %v35_v57 = vld [vmem:[%s3023_s0 + $0x28] sm:$0xff] }
  0x9e   :  { %2605 = vmatpush3.bf16.msra.mxu0 %v2835_v58  ;;  %v2888_v58 = vld [vmem:[#allocation2 + $0x538] sm:$0xff]  }
  0x9f   :  { %2606 = vmatprep.subr.bf16.mxu0 %v2837_v59  ;;  %2627 = vmatpush3.bf16.msra.mxu1 %v2836_v60  ;;  %v134_v59 = vrot.slane %v35_v57, %v2976_v35  ;;  %v127_v60 = vcombine.high %v35_v57, %v35_v57 }
  0xa0   :  { %2628 = vmatprep.subr.bf16.mxu1 %v2838_v61  ;;  %v2889_v61 = vld [vmem:[#allocation2 + $0x5b8] sm:$0xff]  }
  0xa2   :  { %2607 = vmatpush3.bf16.msra.mxu0 %v2839_v62  ;;  %v142_v62 = vcombine.high %v134_v59, %v134_v59 }
  0xa3   :  { %2608 = vmatprep.subr.bf16.mxu0 %v2841_v63  ;;  %2629 = vmatpush3.bf16.msra.mxu1 %v2840_v0  ;;  %v141_v63 = vrot.slane %v127_v60, %v2976_v35  ;;  %v188_v0 = vpack.c.bf16 %v134_v59, %v134_v59 }
  0xa4   :  { %2630 = vmatprep.subr.bf16.mxu1 %v2842_v1  ;;  %v189_v1 = vpack.c.bf16 %v142_v62, %v142_v62 }
  0xa6   :  { %2609 = vmatpush3.bf16.msra.mxu0 %v2843_v2  ;;  %v143_v2 = vcombine.high %v141_v63, %v141_v63 }
  0xa7   :  { %2610 = vmatprep.subr.bf16.mxu0 %v2845_v3  ;;  %2631 = vmatpush3.bf16.msra.mxu1 %v2844_v4  ;;  %v190_v3 = vpack.c.bf16 %v141_v63, %v141_v63 }
  0xa8   :  { %2632 = vmatprep.subr.bf16.mxu1 %v2846_v5  ;;  %v191_v4 = vpack.c.bf16 %v143_v2, %v143_v2 }
  0xaa   :  { %2611 = vmatpush3.bf16.msra.mxu0 %v2847_v6  ;;  %v2231_v6 = vld [vmem:[%s3025_s2] ss:$0 sm:$0xff]  ;;  %s2943_s2 = smov [#allocation5]  }
  0xab   :  { %2612 = vmatprep.subr.bf16.mxu0 %v2849_v7  ;;  %2633 = vmatpush3.bf16.msra.mxu1 %v2848_v8  ;;  %s2222_s11 = sshll.u32 %s2943_s2, 4  ;;  %s2223_s11 = int_to_ptr.vmem [resolvable:$true] %s2222_s11 }
  0xac   :  { %2634 = vmatprep.subr.bf16.mxu1 %v2850_v9  ;;  %s2913_s12 = scalar_lea.vmem %s2223_s11, 32  ;;  %p2918_p9 = scmp.lt.s32.totalorder %s2223_s11, %s2223_s11 }
  0xad   :  { %p2914_p8 = scmp.ne.s32.totalorder %s2223_s11, %s2913_s12  ;;  %p2919_p10 = scmp.lt.s32.totalorder %s2913_s12, %s2913_s12 }
  0xae   :  { %2613 = vmatpush3.bf16.msra.mxu0 %v2851_v10 }
  0xaf   :  { %2614 = vmatprep.subr.bf16.mxu0 %v2853_v11  ;;  %2635 = vmatpush3.bf16.msra.mxu1 %v2852_v12  ;;  %p2920_p11 = por %p2919_p10, %p2918_p9 }
  0xb0   :  { %2636 = vmatprep.subr.bf16.mxu1 %v2854_v13 }
  0xb1   :  { %p2921_p12 = pnand %p2920_p11, %p2914_p8 }
  0xb2   :  { %2615 = vmatpush3.bf16.msra.mxu0 %v2855_v15 }
  0xb3   :  { %2644 = vmatprep.subr.bf16.mxu0 %v2858_v18  ;;  %2637 = vmatpush3.bf16.msra.mxu1 %v2856_v19 }
  0xb4   :  { %2666 = vmatprep.subr.bf16.mxu1 %v2859_v23 }
  0xb5   :  { %2088 = vmatmul.mubr.bf16.vlgmr.msra.gmra.mrb[16].mxu0 %v184_v22 }
  0xb6   :  { %2645 = vmatpush3.bf16.msra.mxu0 %v2860_v26  ;;  %2128 = vmatmul.mubr.bf16.vlgmr.msra.gmra.mrb[16].mxu1 %v186_v27 }
  0xb7   :  { %2646 = vmatprep.subr.bf16.mxu0 %v2862_v28  ;;  %2667 = vmatpush3.bf16.msra.mxu1 %v2861_v30 }
  0xb8   :  { %2668 = vmatprep.subr.bf16.mxu1 %v2863_v31  ;;  %2167 = vmatprep.mubr.bf16.mxu0 %v189_v1 }
  0xb9   :  { %2207 = vmatprep.mubr.bf16.mxu1 %v191_v4 }
  0xba   :  { %2647 = vmatpush3.bf16.msra.mxu0 %v2864_v32 }
  0xbb   :  { %2648 = vmatprep.subr.bf16.mxu0 %v2866_v33  ;;  %2669 = vmatpush3.bf16.msra.mxu1 %v2865_v34 }
  0xbc   :  { %2670 = vmatprep.subr.bf16.mxu1 %v2867_v36 }
  0xbe   :  { %2649 = vmatpush3.bf16.msra.mxu0 %v2868_v37 }
  0xbf   :  { %2650 = vmatprep.subr.bf16.mxu0 %v2870_v38  ;;  %2671 = vmatpush3.bf16.msra.mxu1 %v2869_v39 }
  0xc0   :  { %2672 = vmatprep.subr.bf16.mxu1 %v2871_v40 }
  0xc2   :  { %2651 = vmatpush3.bf16.msra.mxu0 %v2872_v41 }
  0xc3   :  { %2652 = vmatprep.subr.bf16.mxu0 %v2874_v42  ;;  %2673 = vmatpush3.bf16.msra.mxu1 %v2873_v43 }
  0xc4   :  { %2674 = vmatprep.subr.bf16.mxu1 %v2875_v44 }
  0xc6   :  { %2653 = vmatpush3.bf16.msra.mxu0 %v2876_v45 }
  0xc7   :  { %2654 = vmatprep.subr.bf16.mxu0 %v2878_v46  ;;  %2675 = vmatpush3.bf16.msra.mxu1 %v2877_v47 }
  0xc8   :  { %2676 = vmatprep.subr.bf16.mxu1 %v2879_v48 }
  0xca   :  { %2655 = vmatpush3.bf16.msra.mxu0 %v2880_v49 }
  0xcb   :  { %2656 = vmatprep.subr.bf16.mxu0 %v2882_v50  ;;  %2677 = vmatpush3.bf16.msra.mxu1 %v2881_v51 }
  0xcc   :  { %2678 = vmatprep.subr.bf16.mxu1 %v2883_v52 }
  0xce   :  { %2657 = vmatpush3.bf16.msra.mxu0 %v2884_v53 }
  0xcf   :  { %2658 = vmatprep.subr.bf16.mxu0 %v2886_v54  ;;  %2679 = vmatpush3.bf16.msra.mxu1 %v2885_v55 }
  0xd0   :  { %2680 = vmatprep.subr.bf16.mxu1 %v2887_v56 }
  0xd2   :  { %2659 = vmatpush3.bf16.msra.mxu0 %v2888_v58 }
  0xd3   :  { %2681 = vmatpush3.bf16.msra.mxu1 %v2889_v61 }
  0xd5   :  { %2168 = vmatmul.mubr.bf16.vlgmr.msra.gmra.mrb[20].mxu0 %v188_v0 }
  0xd6   :  { %2208 = vmatmul.mubr.bf16.vlgmr.msra.gmra.mrb[20].mxu1 %v190_v3 }
 0x108   :  { %v2440_v5 = vpop.f32.mrb[0].mxu0 }
 0x109   :  { %v2441_v7 = vpop.f32.mrb[1].mxu0  ;;  %v2462_v8 = vpop.f32.mrb[0].mxu1 }
 0x10a   :  { %v2442_v35 = vadd.f32 %v2441_v7, %v2440_v5  ;;  %v2443_v9 = vpop.f32.mrb[2].mxu0  ;;  %v2463_v10 = vpop.f32.mrb[1].mxu1 }
 0x10b   :  { %v2444_v11 = vpop.f32.mrb[3].mxu0  ;;  %v2464_v13 = vadd.f32 %v2463_v10, %v2462_v8  ;;  %v2465_v14 = vpop.f32.mrb[2].mxu1 }
 0x10c   :  { %v1770_v12 = vadd.f32 %v2442_v35, %v2231_v6  ;;  %v2466_v15 = vpop.f32.mrb[3].mxu1 }
 0x10e   :  { %v1810_v16 = vadd.f32 %v2464_v13, %v1770_v12 }
 0x128   :  { %v2484_v17 = vpop.f32.mrb[4].mxu0 }
 0x129   :  { %v2485_v18 = vpop.f32.mrb[5].mxu0  ;;  %v2506_v19 = vpop.f32.mrb[4].mxu1 }
 0x12a   :  { %v2486_v20 = vadd.f32 %v2485_v18, %v2484_v17  ;;  %v2487_v21 = vpop.f32.mrb[6].mxu0  ;;  %v2507_v22 = vpop.f32.mrb[5].mxu1 }
 0x12b   :  { %v2488_v23 = vpop.f32.mrb[7].mxu0  ;;  %v2508_v25 = vadd.f32 %v2507_v22, %v2506_v19  ;;  %v2509_v26 = vpop.f32.mrb[6].mxu1 }
 0x12c   :  { %v1850_v24 = vadd.f32 %v2486_v20, %v1810_v16  ;;  %v2510_v27 = vpop.f32.mrb[7].mxu1 }
 0x12e   :  { %v1890_v28 = vadd.f32 %v2508_v25, %v1850_v24 }
 0x148   :  { %v2528_v29 = vpop.f32.mrb[8].mxu0 }
 0x149   :  { %v2529_v30 = vpop.f32.mrb[9].mxu0  ;;  %v2550_v31 = vpop.f32.mrb[8].mxu1 }
 0x14a   :  { %v2530_v32 = vadd.f32 %v2529_v30, %v2528_v29  ;;  %v2531_v33 = vpop.f32.mrb[10].mxu0  ;;  %v2551_v34 = vpop.f32.mrb[9].mxu1 }
 0x14b   :  { %v2532_v36 = vpop.f32.mrb[11].mxu0  ;;  %v2552_v38 = vadd.f32 %v2551_v34, %v2550_v31  ;;  %v2553_v39 = vpop.f32.mrb[10].mxu1 }
 0x14c   :  { %v1930_v37 = vadd.f32 %v2530_v32, %v1890_v28  ;;  %v2554_v40 = vpop.f32.mrb[11].mxu1 }
 0x14e   :  { %v1970_v41 = vadd.f32 %v2552_v38, %v1930_v37 }
 0x168   :  { %v2572_v42 = vpop.f32.mrb[12].mxu0 }
 0x169   :  { %v2573_v43 = vpop.f32.mrb[13].mxu0  ;;  %v2594_v44 = vpop.f32.mrb[12].mxu1 }
 0x16a   :  { %v2574_v45 = vadd.f32 %v2573_v43, %v2572_v42  ;;  %v2575_v46 = vpop.f32.mrb[14].mxu0  ;;  %v2595_v47 = vpop.f32.mrb[13].mxu1 }
 0x16b   :  { %v2576_v48 = vpop.f32.mrb[15].mxu0  ;;  %v2596_v50 = vadd.f32 %v2595_v47, %v2594_v44  ;;  %v2597_v51 = vpop.f32.mrb[14].mxu1 }
 0x16c   :  { %v2010_v49 = vadd.f32 %v2574_v45, %v1970_v41  ;;  %v2598_v52 = vpop.f32.mrb[15].mxu1 }
 0x16e   :  { %v2050_v53 = vadd.f32 %v2596_v50, %v2010_v49 }
 0x188   :  { %v2616_v54 = vpop.f32.mrb[16].mxu0 }
 0x189   :  { %v2617_v55 = vpop.f32.mrb[17].mxu0  ;;  %v2638_v56 = vpop.f32.mrb[16].mxu1 }
 0x18a   :  { %v2618_v57 = vadd.f32 %v2617_v55, %v2616_v54  ;;  %v2619_v58 = vpop.f32.mrb[18].mxu0  ;;  %v2639_v59 = vpop.f32.mrb[17].mxu1 }
 0x18b   :  { %v2620_v60 = vpop.f32.mrb[19].mxu0  ;;  %v2640_v62 = vadd.f32 %v2639_v59, %v2638_v56  ;;  %v2641_v63 = vpop.f32.mrb[18].mxu1 }
 0x18c   :  { %v2090_v61 = vadd.f32 %v2618_v57, %v2050_v53  ;;  %v2642_v0 = vpop.f32.mrb[19].mxu1 }
 0x18e   :  { %v2130_v1 = vadd.f32 %v2640_v62, %v2090_v61 }
 0x1a8   :  { %v2660_v2 = vpop.f32.mrb[20].mxu0 }
 0x1a9   :  { %v2661_v3 = vpop.f32.mrb[21].mxu0  ;;  %v2682_v4 = vpop.f32.mrb[20].mxu1 }
 0x1aa   :  { %v2662_v5 = vadd.f32 %v2661_v3, %v2660_v2  ;;  %v2663_v6 = vpop.f32.mrb[22].mxu0  ;;  %v2683_v7 = vpop.f32.mrb[21].mxu1 }
 0x1ab   :  { %v2664_v8 = vpop.f32.mrb[23].mxu0  ;;  %v2684_v9 = vadd.f32 %v2683_v7, %v2682_v4  ;;  %v2685_v10 = vpop.f32.mrb[22].mxu1 }
 0x1ac   :  { %v2170_v35 = vadd.f32 %v2662_v5, %v2130_v1  ;;  %v2686_v11 = vpop.f32.mrb[23].mxu1 }
 0x1ae   :  { %v2210_v12 = vadd.f32 %v2684_v9, %v2170_v35 }
 0x1b0   :  { %2215 = vst [vmem:[#allocation5] sm:$0x3] %v2210_v12 }
 0x1b1   :  { %2924 = shalt.err (!%p2921_p12)
}
 0x1b2   :  { %s2925_s15 = scalar_lea.hbm %s3026_s3, 32 }
 0x1b3   :  { %p2926_p13 = scmp.ne.s32.totalorder %s3026_s3, %s2925_s15  ;;  %p2929_p0 = scmp.lt.u32.totalorder %s2925_s15, %s3026_s3 }
 0x1b5   :  { %p2931_p1 = pnand %p2929_p0, %p2926_p13 }
 0x1b7   :  { %2934 = shalt.err (!%p2931_p1)
}
 0x1b8   :  { %2225 = dma.vmem_to_hbm [thread:$0]  %s2223_s11, 32, %s3026_s3, [#allocation4]  }
 0x1b9   :  { %2937 = dma.done.wait [#allocation4], 32  }
 0x1ba   :  { %2938 = vsyncadd [#allocation4], 4294967264 }
 0x1bb   :  { %2229 = vsyncpa [#allocation3], 1 }
 0x1bc   :  { %2230 = vsyncpa [#allocation4], 1 }

</bundles_post_ra>
